<compile_context>
chip_gen: v6e
topology: v6e:2x2x1
jax: 0.10.0
libtpu: 0.0.40
codegen_flags: <defaults>
</compile_context>

<pallas_src>
import functools

import jax
import jax.numpy as jnp
from jax.experimental import pallas as pl
from jax.experimental.pallas import tpu as pltpu

LANE = 128     # lane width of a vreg
SUBLANE = 8    # sublane count of a vreg


def _round_up(x, m):
    return (x + m - 1) // m * m


def mlp_kernel(x_ref, w1_ref, b1_ref, w2_ref, b2_ref, o_ref):
    # fc1: bf16 x bf16 -> f32 accumulate on the MXU.
    h = jnp.dot(x_ref[...], w1_ref[...], preferred_element_type=jnp.float32)
    # Bias + ReLU epilogue in f32 (v5e-safe).
    h = jnp.maximum(h + b1_ref[...], 0.0)
    # fc2: explicit downcast of the activation to the weight dtype (bf16)
    # before the second MXU matmul, f32 accumulate.
    z = jnp.dot(h.astype(w2_ref.dtype), w2_ref[...],
                preferred_element_type=jnp.float32)
    z = z + b2_ref[...]
    # Sigmoid: exp on the EUP, approx reciprocal lowers to EUP vrcp.
    o_ref[...] = pl.reciprocal(1.0 + jnp.exp(-z), approx=True).astype(o_ref.dtype)


@functools.partial(jax.jit, static_argnames=("block_b", "param_dtype"))
def multilabel_network(x, w1, b1, w2, b2, *, block_b=256,
                       param_dtype=jnp.bfloat16):
    """Forward pass of MultilabelNetwork as a batch-tiled Pallas kernel.

    x : [B, input_size] float32
    w1: [input_size, hidden] float32, b1: [1, hidden] float32
    w2: [hidden, output_size] float32, b2: [1, output_size] float32
    returns: [B, output_size] float32 (sigmoid probabilities)
    """
    B, in_size = x.shape
    hidden = w1.shape[1]
    out_size = w2.shape[1]

    # Pad feature dims to 128-lane multiples (lane-dense loads/stores, full
    # MXU columns). Zero padding keeps the math exact: padded hidden columns
    # are 0 after ReLU and multiply zero rows of w2.
    h_pad = _round_up(hidden, LANE)
    o_pad = _round_up(out_size, LANE)

    # Batch tile: use block_b (>=128 feeds the MXU rows) once the batch is
    # large enough; otherwise a single sublane-aligned tile.
    tb = block_b if B >= block_b else _round_up(B, SUBLANE)
    b_padded = _round_up(B, tb)

    xp = jnp.pad(x, ((0, b_padded - B), (0, 0))).astype(param_dtype)
    w1p = jnp.pad(w1, ((0, 0), (0, h_pad - hidden))).astype(param_dtype)
    b1p = jnp.pad(b1, ((0, 0), (0, h_pad - hidden))).astype(jnp.float32)
    w2p = jnp.pad(w2, ((0, h_pad - hidden), (0, o_pad - out_size))).astype(param_dtype)
    b2p = jnp.pad(b2, ((0, 0), (0, o_pad - out_size))).astype(jnp.float32)
    # TODO(synk): on v7x, fp8 weights (with bf16/f32 epilogue) would halve
    # VMEM pressure further; int8 paths do not carry over there.

    grid = (b_padded // tb,)

    flops = 2 * b_padded * in_size * h_pad + 2 * b_padded * h_pad * o_pad
    bytes_accessed = (xp.size * xp.dtype.itemsize
                      + w1p.size * w1p.dtype.itemsize
                      + b1p.size * b1p.dtype.itemsize
                      + w2p.size * w2p.dtype.itemsize
                      + b2p.size * b2p.dtype.itemsize
                      + b_padded * o_pad * 4)
    cost = pl.CostEstimate(flops=flops,
                           transcendentals=b_padded * o_pad,
                           bytes_accessed=bytes_accessed)

    out_padded = pl.pallas_call(
        mlp_kernel,
        out_shape=jax.ShapeDtypeStruct((b_padded, o_pad), jnp.float32),
        grid_spec=pltpu.PrefetchScalarGridSpec(
            num_scalar_prefetch=0,
            grid=grid,
            in_specs=[
                # Batch-tiled activations.
                pl.BlockSpec((tb, in_size), lambda i: (i, 0)),
                # Weights/biases: full blocks, resident across the batch grid.
                pl.BlockSpec((in_size, h_pad), lambda i: (0, 0)),
                pl.BlockSpec((1, h_pad), lambda i: (0, 0)),
                pl.BlockSpec((h_pad, o_pad), lambda i: (0, 0)),
                pl.BlockSpec((1, o_pad), lambda i: (0, 0)),
            ],
            out_specs=pl.BlockSpec((tb, o_pad), lambda i: (i, 0)),
        ),
        compiler_params=pltpu.CompilerParams(
            dimension_semantics=("parallel",),
            vmem_limit_bytes=64 * 1024 * 1024,
        ),
        cost_estimate=cost,
    )(xp, w1p, b1p, w2p, b2p)

    # Strip batch and lane padding.
    return out_padded[:B, :out_size]


def multilabel_network_ref(x, w1, b1, w2, b2, param_dtype=jnp.bfloat16):
    """Pure-JAX reference with the same bf16-input / f32-accumulate casts."""
    c = lambda a: a.astype(param_dtype).astype(jnp.float32)
    h = jnp.maximum(c(x) @ c(w1) + b1.astype(jnp.float32), 0.0)
    z = c(h) @ c(w2) + b2.astype(jnp.float32)
    return 1.0 / (1.0 + jnp.exp(-z))


def init_linear_params(key, fan_in, fan_out):
    """Mimics torch.nn.Linear default init (U[-k, k], k = 1/sqrt(fan_in))."""
    k = 1.0 / jnp.sqrt(jnp.float32(fan_in))
    kw, kb = jax.random.split(key)
    w = jax.random.uniform(kw, (fan_in, fan_out), jnp.float32, -k, k)
    b = jax.random.uniform(kb, (1, fan_out), jnp.float32, -k, k)
    return w, b


if __name__ == "__main__":
    # Small shapes consistent with the module's forward:
    #   input_size=16, hidden_size=32, output_size=4, batch=8
    batch, input_size, hidden_size, output_size = 8, 16, 32, 4

    key = jax.random.PRNGKey(0)
    kx, k1, k2 = jax.random.split(key, 3)

    x = jax.random.normal(kx, (batch, input_size), jnp.float32)
    w1, b1 = init_linear_params(k1, input_size, hidden_size)
    w2, b2 = init_linear_params(k2, hidden_size, output_size)

    out = multilabel_network(x, w1, b1, w2, b2)
    out = jax.block_until_ready(out)

    ref = multilabel_network_ref(x, w1, b1, w2, b2)
    assert out.shape == (batch, output_size)
    # Tolerance covers the approx=True reciprocal (~1e-3 rel) in the sigmoid.
    assert jnp.allclose(out, ref, atol=5e-3, rtol=5e-3), (
        float(jnp.max(jnp.abs(out - ref))))

    print("KERNEL_OK")
</pallas_src>

<mosaic_0001>
module attributes {stable_mosaic.version = 11 : i64} {
  func.func @mlp_kernel(%arg0: i32, %arg1: memref<8x16xbf16, #tpu.memory_space<vmem>>, %arg2: memref<16x128xbf16, #tpu.memory_space<vmem>>, %arg3: memref<1x128xf32, #tpu.memory_space<vmem>>, %arg4: memref<128x128xbf16, #tpu.memory_space<vmem>>, %arg5: memref<1x128xf32, #tpu.memory_space<vmem>>, %arg6: memref<8x128xf32, #tpu.memory_space<vmem>>) attributes {dimension_semantics = [#tpu.dimension_semantics<parallel>], iteration_bounds = array<i64: 1>, scalar_prefetch = 0 : i64, scratch_operands = 0 : i64, tpu.core_type = #tpu.core_type<tc>, window_params = [{transform_indices = @transform_0, window_bounds = array<i64: 8, 16>}, {pipeline_mode = #tpu.pipeline_mode<synchronous>, transform_indices = @transform_1, window_bounds = array<i64: 16, 128>}, {pipeline_mode = #tpu.pipeline_mode<synchronous>, transform_indices = @transform_2, window_bounds = array<i64: 1, 128>}, {pipeline_mode = #tpu.pipeline_mode<synchronous>, transform_indices = @transform_3, window_bounds = array<i64: 128, 128>}, {pipeline_mode = #tpu.pipeline_mode<synchronous>, transform_indices = @transform_4, window_bounds = array<i64: 1, 128>}, {transform_indices = @transform_5, window_bounds = array<i64: 8, 128>}]} {
    %c0 = arith.constant 0 : index
    %c0_0 = arith.constant 0 : index
    %0 = vector.load %arg1[%c0, %c0_0] : memref<8x16xbf16, #tpu.memory_space<vmem>>, vector<8x16xbf16>
    %c0_1 = arith.constant 0 : index
    %c0_2 = arith.constant 0 : index
    %1 = vector.load %arg2[%c0_1, %c0_2] : memref<16x128xbf16, #tpu.memory_space<vmem>>, vector<16x128xbf16>
    %cst = arith.constant dense<0.000000e+00> : vector<8x128xf32>
    %2 = tpu.matmul %0, %1, %cst {dimension_numbers = #tpu.dot_dimension_numbers<[1], [0], [0], [1], [0, 0, 1, 1], [], []>} : vector<8x16xbf16>, vector<16x128xbf16>, vector<8x128xf32> -> vector<8x128xf32>
    %c0_3 = arith.constant 0 : index
    %c0_4 = arith.constant 0 : index
    %3 = vector.load %arg3[%c0_3, %c0_4] : memref<1x128xf32, #tpu.memory_space<vmem>>, vector<1x128xf32>
    %4 = vector.broadcast %3 : vector<1x128xf32> to vector<8x128xf32>
    %5 = arith.addf %2, %4 : vector<8x128xf32>
    %cst_5 = arith.constant 0.000000e+00 : f32
    %6 = vector.broadcast %cst_5 : f32 to vector<8x128xf32>
    %7 = arith.maximumf %5, %6 : vector<8x128xf32>
    %8 = arith.truncf %7 : vector<8x128xf32> to vector<8x128xbf16>
    %c0_6 = arith.constant 0 : index
    %c0_7 = arith.constant 0 : index
    %9 = vector.load %arg4[%c0_6, %c0_7] : memref<128x128xbf16, #tpu.memory_space<vmem>>, vector<128x128xbf16>
    %cst_8 = arith.constant dense<0.000000e+00> : vector<8x128xf32>
    %10 = tpu.matmul %8, %9, %cst_8 {dimension_numbers = #tpu.dot_dimension_numbers<[1], [0], [0], [1], [0, 0, 1, 1], [], []>} : vector<8x128xbf16>, vector<128x128xbf16>, vector<8x128xf32> -> vector<8x128xf32>
    %c0_9 = arith.constant 0 : index
    %c0_10 = arith.constant 0 : index
    %11 = vector.load %arg5[%c0_9, %c0_10] : memref<1x128xf32, #tpu.memory_space<vmem>>, vector<1x128xf32>
    %12 = vector.broadcast %11 : vector<1x128xf32> to vector<8x128xf32>
    %13 = arith.addf %10, %12 : vector<8x128xf32>
    %cst_11 = arith.constant 0.000000e+00 : f32
    %14 = vector.broadcast %cst_11 : f32 to vector<8x128xf32>
    %15 = arith.subf %14, %13 : vector<8x128xf32>
    %16 = math.exp %15 : vector<8x128xf32>
    %cst_12 = arith.constant 1.000000e+00 : f32
    %17 = vector.broadcast %cst_12 : f32 to vector<8x128xf32>
    %18 = arith.addf %17, %16 : vector<8x128xf32>
    %19 = tpu.reciprocal %18 {approx = true} : vector<8x128xf32> -> vector<8x128xf32>
    %c0_13 = arith.constant 0 : index
    %c0_14 = arith.constant 0 : index
    %20 = vector.load %arg6[%c0_13, %c0_14] : memref<8x128xf32, #tpu.memory_space<vmem>>, vector<8x128xf32>
    tpu.vector_store %arg6[%c0_13, %c0_14], %19 {strides = array<i32>} : memref<8x128xf32, #tpu.memory_space<vmem>>, vector<8x128xf32>,
    return
  }
  func.func @transform_0(%arg0: i32) -> (i32, i32) {
    %c0_i32 = arith.constant 0 : i32
    %c0_i32_0 = arith.constant 0 : i32
    return %arg0, %c0_i32 : i32, i32
  }
  func.func @transform_1(%arg0: i32) -> (i32, i32) {
    %c0_i32 = arith.constant 0 : i32
    %c0_i32_0 = arith.constant 0 : i32
    %c0_i32_1 = arith.constant 0 : i32
    return %c0_i32, %c0_i32_0 : i32, i32
  }
  func.func @transform_2(%arg0: i32) -> (i32, i32) {
    %c0_i32 = arith.constant 0 : i32
    %c0_i32_0 = arith.constant 0 : i32
    %c0_i32_1 = arith.constant 0 : i32
    return %c0_i32, %c0_i32_0 : i32, i32
  }
  func.func @transform_3(%arg0: i32) -> (i32, i32) {
    %c0_i32 = arith.constant 0 : i32
    %c0_i32_0 = arith.constant 0 : i32
    %c0_i32_1 = arith.constant 0 : i32
    return %c0_i32, %c0_i32_0 : i32, i32
  }
  func.func @transform_4(%arg0: i32) -> (i32, i32) {
    %c0_i32 = arith.constant 0 : i32
    %c0_i32_0 = arith.constant 0 : i32
    %c0_i32_1 = arith.constant 0 : i32
    return %c0_i32, %c0_i32_0 : i32, i32
  }
  func.func @transform_5(%arg0: i32) -> (i32, i32) {
    %c0_i32 = arith.constant 0 : i32
    %c0_i32_0 = arith.constant 0 : i32
    return %arg0, %c0_i32 : i32, i32
  }
}

</mosaic_0001>

<bundles_post_ra>
// kernel: multilabel_network.1
= control target key start
LH: loop header
LB: loop body
LE: loop exit
PB: predicated region body
PF: predicated region fallthrough
CT: control target
= control target key end

     0   :  { %v268_v0 = vmov 0.0   ;;  %vm269_vm0 = vmmov 0   ;;  %vm37_vm1 = vcmask 130048   ;;  %s339_s1 = inlined_call_operand.vmem [shape: bf16[16,128], index: 1, kind: input, shape index: {}]   ;;  %s340_s0 = inlined_call_operand.vmem [shape: bf16[8,16], index: 0, kind: input, shape index: {}]   ;;  %s341_s3 = inlined_call_operand.vmem [shape: bf16[128,128], index: 3, kind: input, shape index: {}]   ;;  %s342_s2 = inlined_call_operand.vmem [shape: f32[1,128], index: 2, kind: input, shape index: {}]   ;;  %s343_s4 = inlined_call_operand.vmem [shape: f32[1,128], index: 4, kind: input, shape index: {}]   ;;  %s344_s5 = inlined_call_operand.vmem [shape: f32[8,128], index: 5, kind: output, shape index: {}]  }
   0x1   :  { %227 = vmatprep.subr.bf16.mxu0 %v268_v0  ;;  %v255_v1 = vld [vmem:[%s339_s1] sm:$0xff]   ;;  %229 = vmatprep.mubr.msk.bf16.mxu0 %vm269_vm0, %v268_v0  ;;  %v256_v3 = vld [vmem:[%s341_s3 + $0x38] sm:$0xff]   ;;  %v257_v4 = vld [vmem:[%s341_s3 + $0x30] sm:$0xff]  }
   0x2   :  { %v21_v2 = vld [vmem:[%s340_s0] sm:$0xf]  ;;  %233 = vmatprep.subr.bf16.mxu1 %v268_v0  ;;  %249 = vmatprep.mubr.msk.bf16.mxu1 %vm269_vm0, %v268_v0  ;;  %v258_v5 = vld [vmem:[%s341_s3 + $0x28] sm:$0xff]   ;;  %v260_v7 = vld [vmem:[%s341_s3 + $0x18] sm:$0xff]  }
   0x3   :  { %228 = vmatpush3.bf16.msra.mxu0 %v255_v1  ;;  %234 = vmatpush3.bf16.msra.mxu1 %v256_v3  ;;  %v259_v6 = vld [vmem:[%s341_s3 + $0x20] sm:$0xff]   ;;  %v261_v8 = vld [vmem:[%s341_s3 + $0x10] sm:$0xff]   ;;  %v262_v9 = vld [vmem:[%s341_s3 + $0x8] sm:$0xff]  }
   0x4   :  { %235 = vmatprep.subr.bf16.mxu1 %v268_v0  ;;  %v263_v10 = vld [vmem:[%s341_s3] sm:$0xff]  }
   0x5   :  { %v204_v11 = vld [vmem:[%s342_s2] ss:$0 sm:$0xff] }
   0x6   :  { %230 = vmatmul.mubr.msk.bf16.vlgmr.msra.gmra.mxu0 %vm37_vm1, %v21_v2  ;;  %v207_v19 = vld [vmem:[%s343_s4] ss:$0 sm:$0xff] }
   0x7   :  { %236 = vmatpush3.bf16.msra.mxu1 %v257_v4 }
   0x8   :  { %237 = vmatprep.subr.bf16.mxu1 %v268_v0 }
   0xb   :  { %238 = vmatpush3.bf16.msra.mxu1 %v258_v5 }
   0xc   :  { %239 = vmatprep.subr.bf16.mxu1 %v268_v0 }
   0xf   :  { %240 = vmatpush3.bf16.msra.mxu1 %v259_v6 }
  0x10   :  { %241 = vmatprep.subr.bf16.mxu1 %v268_v0 }
  0x13   :  { %242 = vmatpush3.bf16.msra.mxu1 %v260_v7 }
  0x14   :  { %243 = vmatprep.subr.bf16.mxu1 %v268_v0 }
  0x17   :  { %244 = vmatpush3.bf16.msra.mxu1 %v261_v8 }
  0x18   :  { %245 = vmatprep.subr.bf16.mxu1 %v268_v0 }
  0x1b   :  { %246 = vmatpush3.bf16.msra.mxu1 %v262_v9 }
  0x1c   :  { %247 = vmatprep.subr.bf16.mxu1 %v268_v0 }
  0x1f   :  { %248 = vmatpush3.bf16.msra.mxu1 %v263_v10 }
  0xc6   :  { %v75_v12 = vpop.f32.mrf.mxu0 }
  0xc7   :  { %v76_v13 = vadd.f32 %v204_v11, %v75_v12 }
  0xc8   :  { %v231_v14 = vpop.f32.mrf.mxu0 }
  0xc9   :  { %v81_v15 = vmax.f32 %v76_v13, 0.0 }
  0xca   :  { %v78_v16 = vpop.f32.mrf.mxu0 }
  0xcb   :  { %v82_v17 = vpack.c.bf16 %v81_v15, %v81_v15 }
  0xcc   :  { %v232_v18 = vpop.f32.mrf.mxu0 }
  0xcd   :  { %250 = vmatmul.mubr.bf16.vlgmr.msra.gmra.mxu1 %v82_v17 }
 0x18d   :  { %v188_v20 = vpop.f32.mrf.mxu1 }
 0x18e   :  { %v189_v21 = vadd.f32 %v207_v19, %v188_v20 }
 0x18f   :  { %v251_v22 = vpop.f32.mrf.mxu1 }
 0x190   :  { %v194_v23 = vsub.f32 0.0, %v189_v21 }
 0x191   :  { %v191_v24 = vpop.f32.mrf.mxu1 }
 0x192   :  { %v195_v25 = vmul.f32 1.442695, %v194_v23 }
 0x193   :  { %v252_v26 = vpop.f32.mrf.mxu1 }
 0x194   :  { %264 = vpow2.f32 %v195_v25 }
 0x1a1   :  { %v265_v27 = vpop.eup %264 }
 0x1a2   :  { %v197_v28 = vadd.f32 1.0, %v265_v27 }
 0x1a4   :  { %266 = vrcp.f32 %v197_v28 }
 0x1b1   :  { %v267_v29 = vpop.eup %266 }
 0x1b2   :  { %199 = vst [vmem:[%s344_s5] sm:$0xff] %v267_v29 }

</bundles_post_ra>
